<compile_context>
chip_gen: v7x
topology: tpu7x:2x2x1
jax: 0.10.0
libtpu: 0.0.40
codegen_flags: <defaults>
</compile_context>

<pallas_src>
import jax
import jax.numpy as jnp
from jax.experimental import pallas as pl
from jax.experimental.pallas import tpu as pltpu


def _prox_embed_kernel(x_ref, tcol_ref, o_ref):
    # x_ref:    (C, TILE_HW) spatial tile of one batch element
    # tcol_ref: (C, 1) precomputed column-sum of transit
    x = x_ref[...].astype(jnp.float32)
    tcol = tcol_ref[...].astype(jnp.float32)            # (C, 1)

    # channel-sum of the input: sum_c x[b, c, h, w]
    s = jnp.sum(x, axis=0, keepdims=True)                # (1, TILE_HW)

    # logits[n, hw] = tcol[n] * s[hw]  (outer product via broadcast)
    logits = tcol * s                                    # (C, TILE_HW)

    # softmax over the channel axis (axis 0 here == dim=1 in NCHW)
    m = jnp.max(logits, axis=0, keepdims=True)
    e = jnp.exp(logits - m)
    denom = jnp.sum(e, axis=0, keepdims=True)
    inv = pl.reciprocal(denom, approx=False)             # exact parity
    o_ref[...] = (e * inv).astype(o_ref.dtype)


def proximal_embedding_forward(x, transit, *, max_tile_hw=512):
    """x: (B, C, H, W); transit: (C, C)  ->  (B, C, H, W)."""
    B, C, H, W = x.shape
    HW = H * W

    # Pad H*W to a multiple of 128 lanes (full, unmasked vector stores), then
    # pick the largest 128-multiple tile <= max_tile_hw dividing the padded
    # extent.  Padded columns softmax to 1/C (no NaNs) and are sliced off.
    hw128 = pl.cdiv(HW, 128) * 128
    tile_hw = 128
    for cand in range(min(max_tile_hw, hw128), 127, -128):
        if hw128 % cand == 0:
            tile_hw = cand
            break
    n_hw_tiles = hw128 // tile_hw

    x_flat = x.reshape(B, C, HW)
    if hw128 != HW:
        x_flat = jnp.pad(x_flat, ((0, 0), (0, 0), (0, hw128 - HW)))

    # Precompute sum_m transit[m, n] once; kernel only needs this (C, 1) vector.
    tcol = jnp.sum(transit, axis=0).reshape(C, 1)

    out_flat = pl.pallas_call(
        _prox_embed_kernel,
        out_shape=jax.ShapeDtypeStruct((B, C, hw128), x.dtype),
        grid_spec=pl.GridSpec(
            grid=(B, n_hw_tiles),
            in_specs=[
                # one batch element x one spatial tile per grid step
                pl.BlockSpec((None, C, tile_hw), lambda b, h: (b, 0, h)),
                # full (C, 1) transit column-sum every step
                pl.BlockSpec((C, 1), lambda b, h: (0, 0)),
            ],
            out_specs=pl.BlockSpec((None, C, tile_hw), lambda b, h: (b, 0, h)),
        ),
        compiler_params=pltpu.CompilerParams(
            dimension_semantics=("parallel", "parallel"),
        ),
    )(x_flat, tcol)

    if hw128 != HW:
        out_flat = out_flat[:, :, :HW]
    return out_flat.reshape(B, C, H, W)


if __name__ == "__main__":
    # Module hyperparameters (n_channels, k, padding) — forward only uses
    # n_channels via `transit`; proximity_filter is only used by log_prob.
    B, C, H, W = 2, 4, 16, 16

    key = jax.random.PRNGKey(0)
    x = jax.random.normal(key, (B, C, H, W), dtype=jnp.float32)

    # Deterministic parameter init, matching nn.Parameter(torch.ones(C, C)).
    transit = jnp.ones((C, C), dtype=jnp.float32)

    out = proximal_embedding_forward(x, transit)
    out = jax.block_until_ready(out)

    # Pure-JAX reference of the PyTorch forward.
    ref = jax.nn.softmax(jnp.einsum("ijkl,mn->inkl", x, transit), axis=1)
    assert out.shape == (B, C, H, W)
    assert jnp.allclose(out, ref, atol=1e-5, rtol=1e-5)

    print("KERNEL_OK")
</pallas_src>

<mosaic_0001>
module attributes {stable_mosaic.version = 11 : i64} {
  func.func @_prox_embed_kernel(%arg0: i32, %arg1: i32, %arg2: memref<1x4x256xf32, #tpu.memory_space<vmem>>, %arg3: memref<4x1xf32, #tpu.memory_space<vmem>>, %arg4: memref<1x4x256xf32, #tpu.memory_space<vmem>>) attributes {dimension_semantics = [#tpu.dimension_semantics<parallel>, #tpu.dimension_semantics<parallel>], iteration_bounds = array<i64: 2, 1>, scalar_prefetch = 0 : i64, scratch_operands = 0 : i64, tpu.core_type = #tpu.core_type<tc>, window_params = [{transform_indices = @transform_0, window_bounds = array<i64: 1, 4, 256>}, {pipeline_mode = #tpu.pipeline_mode<synchronous>, transform_indices = @transform_1, window_bounds = array<i64: 4, 1>}, {transform_indices = @transform_2, window_bounds = array<i64: 1, 4, 256>}]} {
    %c0 = arith.constant 0 : index
    %c0_0 = arith.constant 0 : index
    %c0_1 = arith.constant 0 : index
    %0 = vector.load %arg2[%c0, %c0_0, %c0_1] : memref<1x4x256xf32, #tpu.memory_space<vmem>>, vector<1x4x256xf32>
    %1 = vector.shape_cast %0 : vector<1x4x256xf32> to vector<4x256xf32>
    %c0_2 = arith.constant 0 : index
    %c0_3 = arith.constant 0 : index
    %2 = vector.load %arg3[%c0_2, %c0_3] : memref<4x1xf32, #tpu.memory_space<vmem>>, vector<4x1xf32>
    %cst = arith.constant dense<0.000000e+00> : vector<256xf32>
    %3 = vector.multi_reduction <add>, %1, %cst [0] : vector<4x256xf32> to vector<256xf32>
    %4 = vector.shape_cast %3 : vector<256xf32> to vector<1x256xf32>
    %5 = vector.broadcast %2 : vector<4x1xf32> to vector<4x256xf32>
    %6 = vector.broadcast %4 : vector<1x256xf32> to vector<4x256xf32>
    %7 = arith.mulf %5, %6 : vector<4x256xf32>
    %cst_4 = arith.constant dense<0xFF800000> : vector<256xf32>
    %8 = vector.multi_reduction <maximumf>, %7, %cst_4 [0] : vector<4x256xf32> to vector<256xf32>
    %9 = vector.shape_cast %8 : vector<256xf32> to vector<1x256xf32>
    %10 = vector.broadcast %9 : vector<1x256xf32> to vector<4x256xf32>
    %11 = arith.subf %7, %10 : vector<4x256xf32>
    %12 = math.exp %11 : vector<4x256xf32>
    %cst_5 = arith.constant dense<0.000000e+00> : vector<256xf32>
    %13 = vector.multi_reduction <add>, %12, %cst_5 [0] : vector<4x256xf32> to vector<256xf32>
    %14 = vector.shape_cast %13 : vector<256xf32> to vector<1x256xf32>
    %15 = tpu.reciprocal %14 : vector<1x256xf32> -> vector<1x256xf32>
    %16 = vector.broadcast %15 : vector<1x256xf32> to vector<4x256xf32>
    %17 = arith.mulf %12, %16 : vector<4x256xf32>
    %c0_6 = arith.constant 0 : index
    %c0_7 = arith.constant 0 : index
    %c0_8 = arith.constant 0 : index
    %18 = vector.load %arg4[%c0_6, %c0_7, %c0_8] : memref<1x4x256xf32, #tpu.memory_space<vmem>>, vector<1x4x256xf32>
    %19 = vector.shape_cast %18 : vector<1x4x256xf32> to vector<4x256xf32>
    %20 = vector.shape_cast %17 : vector<4x256xf32> to vector<1x4x256xf32>
    tpu.vector_store %arg4[%c0_6, %c0_7, %c0_8], %20 {strides = array<i32>} : memref<1x4x256xf32, #tpu.memory_space<vmem>>, vector<1x4x256xf32>,
    return
  }
  func.func @transform_0(%arg0: i32, %arg1: i32) -> (i32, i32, i32) {
    %c0_i32 = arith.constant 0 : i32
    %c0_i32_0 = arith.constant 0 : i32
    return %arg0, %c0_i32, %arg1 : i32, i32, i32
  }
  func.func @transform_1(%arg0: i32, %arg1: i32) -> (i32, i32) {
    %c0_i32 = arith.constant 0 : i32
    %c0_i32_0 = arith.constant 0 : i32
    %c0_i32_1 = arith.constant 0 : i32
    return %c0_i32, %c0_i32_0 : i32, i32
  }
  func.func @transform_2(%arg0: i32, %arg1: i32) -> (i32, i32, i32) {
    %c0_i32 = arith.constant 0 : i32
    %c0_i32_0 = arith.constant 0 : i32
    return %arg0, %c0_i32, %arg1 : i32, i32, i32
  }
}

</mosaic_0001>

<bundles_post_ra>
// kernel: tpu_custom_call.1
= control target key start
LH: loop header
LB: loop body
LE: loop exit
PB: predicated region body
PF: predicated region fallthrough
CT: control target
= control target key end

     0   :  { %7 = vsyncpa [#allocation3], 0  ;;  %s758_s0 = inlined_call_operand.hbm [shape: f32[2,4,256], index: 0, kind: input, shape index: {}]   ;;  %s759_s1 = inlined_call_operand.vmem [shape: f32[4,1], index: 1, kind: input, shape index: {}]   ;;  %s760_s2 = inlined_call_operand.hbm [shape: f32[2,4,256], index: 2, kind: output, shape index: {}]  }
   0x1   :  { %9 = vsyncpa [#allocation3 + $0x1], 0 }
   0x2   :  { %10 = vsyncpa [#allocation4], 0 }
   0x3   :  { %12 = vsyncpa [#allocation4 + $0x1], 0  ;;  %s573_s9 = smov 0   ;;  %s575_s10 = smov 0  }
   0x4   :  { %s577_s11 = smov 0   ;;  %s579_s12 = smov 0  }
   0x5   :  { %s581_s13 = smov 0   ;;  %s583_s14 = smov 0  }
   0x6 LB: > { %s351_s15 = sadd.s32 4294967295, %s553_s14   ;;  %s352_s16 = sadd.s32 4294967294, %s553_s14   ;;  %s553_s14 = sphi %s583_s14, %s18_s14   ;;  %s549_s13 = sphi %s581_s13, %s776_s13   ;;  %s545_s12 = sphi %s579_s12, %s775_s12   ;;  %s541_s11 = sphi %s577_s11, %s774_s11   ;;  %s537_s10 = sphi %s575_s10, %s773_s10   ;;  %s533_s9 = sphi %s573_s9, %s772_s9  }
   0x7   : > { %s30_s17 = sadd.s32 1, %s549_s13  ;;  %s39_s18 = sadd.s32 1, %s541_s11 }
   0x8   : > { %p32_p0 = scmp.ge.s32.totalorder %s30_s17, 2  ;;  %p46_p1 = scmp.ne.s32.totalorder %s541_s11, %s537_s10 }
   0x9   : > { %p47_p2 = scmp.eq.s32.totalorder %s553_s14, 0  ;;  %p52_p3 = scmp.ne.s32.totalorder %s537_s10, %s533_s9 }
   0xa   : > { %s778_s17 = smov (%p32_p0, %s30_s17), 0  ;;  %p53_p5 = scmp.eq.s32.totalorder %s351_s15, 0 }
   0xb   : > { %p614_p4 = por %p47_p2, %p46_p1  ;;  %s34_s20 = ssub.s32 %s549_s13, %s778_s17 }
   0xc   : > { %p99_p6 = scmp.eq.s32.totalorder %s351_s15, 1  ;;  %p37_p7 = scmp.eq.s32.totalorder %s34_s20, 0 }
   0xd   : > { %p620_p8 = por %p53_p5, %p52_p3  ;;  %p105_p10 = scmp.eq.s32.totalorder %s352_s16, 1 }
   0xe   : > { %p624_p9 = por %p99_p6, %p46_p1  ;;  %p380_p13 = scmp.lt.s32.totalorder %s553_s14, 2 }
   0xf   : > { %s629_s23 = scalar_select %p37_p7, %s541_s11, %s39_s18  }
  0x10   : > { %s764_s22 = scalar_select %p624_p9, 1, 0 }
  0x11   : > { %p631_p11 = por %p105_p10, %p52_p3  ;;  %s128_s25 = sand.u32 1, %s541_s11  }
  0x12   : > { %s355_s26 = sshll.u32 %s128_s25, 3  ;;  %s366_s27 = sshll.u32 %s549_s13, 7 }
  0x13   : > { %s765_s24 = scalar_select %p631_p11, 1, 0 }
  0x14   : > { %s642_s30 = scalar_lea.hbm %s758_s0, %s366_s27  ;;  %s132_s3 = scalar_lea.vmem [#allocation2], %s355_s26 }
  0x15   : > { %s142_s4 = sshll.u32 %s132_s3, 4  ;;  %p648_p0 = pnand %p380_p13, %p614_p4  ;;  %s644_s4 = int_to_ptr.vmem [resolvable:$true] %s142_s4 }
  0x16   : > { %s129_s6 = scalar_lea.sflag [#allocation3], %s128_s25  ;;  %s441_s7 = scalar_lea.hbm %s642_s30, 128 }
  0x17   : > { %p442_p3 = scmp.ne.s32.totalorder %s642_s30, %s441_s7  ;;  %p443_p5 = pneg %p648_p0 }
  0x18   : > { %s446_s16 = scalar_lea.hbm %s758_s0, 256  ;;  %p447_p4 = scmp.lt.u32.totalorder %s642_s30, %s758_s0 }
  0x19   : > { %p444_p6 = pnand %p443_p5, %p442_p3  ;;  %p448_p10 = scmp.lt.u32.totalorder %s446_s16, %s441_s7 }
  0x1a   : > { %p450_p12 = scmp.lt.u32.totalorder %s441_s7, %s642_s30 }
  0x1b   : > { %p445_p7 = pneg %p444_p6  ;;  %p449_p13 = por %p448_p10, %p447_p4 }
  0x1d   : > { %p451_p1 = por %p450_p12, %p449_p13 }
  0x1f   : > { %p452_p2 = pnand %p451_p1, %p445_p7 }
  0x21   : > { %455 = shalt.err (!%p452_p2)
}
  0x22   : > { %s456_s20 = scalar_lea.vmem %s644_s4, 128  ;;  %s555_s25 = smov [#allocation2]  }
  0x23   : > { %p457_p3 = scmp.ne.s32.totalorder %s644_s4, %s456_s20  ;;  %s461_s26 = sshll.u32 %s555_s25, 4  ;;  %s462_s26 = int_to_ptr.vmem [resolvable:$false] %s461_s26 }
  0x24   : > { %s463_s27 = scalar_lea.vmem %s462_s26, 256  ;;  %p464_p9 = scmp.lt.s32.totalorder %s644_s4, %s462_s26 }
  0x25   : > { %p459_p6 = pnand %p457_p3, %p443_p5  ;;  %p465_p4 = scmp.lt.s32.totalorder %s463_s27, %s456_s20 }
  0x27   : > { %p460_p11 = pneg %p459_p6  ;;  %p466_p10 = por %p465_p4, %p464_p9 }
  0x29   : > { %p467_p12 = pnand %p466_p10, %p460_p11 }
  0x2b   : > { %470 = shalt.err (!%p467_p12)
}
  0x2c   : > { %375 = dma.hbm_to_vmem [thread:$0]  (!%p648_p0), %s642_s30, 128, %s644_s4, %s129_s6  }
  0x2d   : > { %p767_p1 = scmp.lt.s32.totalorder %s553_s14, 3  ;;  %p768_p2 = scmp.ge.s32.totalorder %s553_s14, 1 }
  0x2f   : > { %p148_p5 = pnand %p768_p2, %p767_p1 }
  0x30   : > { %s684_s28 = sand.u32 (!%p148_p5), 1, %s537_s10  }
  0x31   : > { %151 = sbr.rel (%p148_p5) target bundleno = 260 (0x104), region = 28  ;;  %s359_s29 = sshll.u32 (!%p148_p5), %s684_s28, 3 }
  0x32   : > { %s154_s3 = scalar_lea.sflag (!%p148_p5), [#allocation3], %s684_s28  ;;  %s157_s5 = scalar_lea.vmem (!%p148_p5), [#allocation2], %s359_s29 }
  0x38   : > { %524 = dma.done.wait (%p620_p8), %s154_s3, 128  }
  0x39   : > { %526 = vsyncadd (%p620_p8), %s154_s3, 4294967168  ;;  %v556_v0 = vmov 0   ;;  %v181_v1 = vld [vmem:[%s759_s1] sm:$0xf]  ;;  %vm185_vm0 = vcmask 1043456   ;;  %s367_s21 = sshll.u32 %s545_s12, 7 }
  0x3a   : > { %431 = vset.pattern.permute.xlu0 %v556_v0  ;;  %v180_v2 = vld [vmem:[%s157_s5] sm:$0xff]  ;;  %s177_s6 = scalar_lea.vmem [#allocation5], %s359_s29  ;;  %s709_s16 = scalar_lea.hbm %s760_s2, %s367_s21 }
  0x3b   : > { %202 = vperm.xlu0 %431, %v181_v1   ;;  %v183_v3 = vcombine.high %v180_v2, %v180_v2  ;;  %v186_v4 = vsel %vm185_vm0, %v180_v2, 0.0  ;;  %s267_s7 = sshll.u32 %s177_s6, 4  ;;  %s251_s18 = scalar_lea.sflag [#allocation4], %s684_s28  ;;  %s711_s7 = int_to_ptr.vmem [resolvable:$true] %s267_s7 }
  0x3c   : > { %v187_v6 = vrot.slane %v186_v4, 4  ;;  %s471_s19 = scalar_lea.vmem %s711_s7, 128  ;;  %p769_p9 = scmp.ne.s32.totalorder %s764_s22, 0 }
  0x3d   : > { %v193_v5 = vsel %vm185_vm0, %v183_v3, 0.0  ;;  %p472_p8 = scmp.ne.s32.totalorder %s711_s7, %s471_s19  ;;  %s557_s12 = smov [#allocation5]  }
  0x3e   : > { %v194_v7 = vrot.slane %v193_v5, 4  ;;  %v188_v8 = vadd.f32 %v187_v6, %v186_v4  ;;  %s475_s20 = sshll.u32 %s557_s12, 4  ;;  %s476_s20 = int_to_ptr.vmem [resolvable:$false] %s475_s20 }
  0x3f   : > { %p473_p11 = pnand %p472_p8, %p769_p9  ;;  %s477_s25 = scalar_lea.vmem %s476_s20, 256 }
  0x40   : > { %v195_v9 = vadd.f32 %v194_v7, %v193_v5  ;;  %v189_v10 = vrot.slane %v188_v8, 2  ;;  %p478_p7 = scmp.lt.s32.totalorder %s711_s7, %s476_s20  ;;  %p479_p13 = scmp.lt.s32.totalorder %s477_s25, %s471_s19 }
  0x41   : > { %p474_p0 = pneg %p473_p11 }
  0x42   : > { %v196_v11 = vrot.slane %v195_v9, 2  ;;  %v190_v12 = vadd.f32 %v189_v10, %v188_v8  ;;  %p480_p3 = por %p479_p13, %p478_p7 }
  0x44   : > { %v197_v13 = vadd.f32 %v196_v11, %v195_v9  ;;  %v191_v14 = vrot.slane %v190_v12, 1  ;;  %p481_p6 = pnand %p480_p3, %p474_p0 }
  0x46   : > { %v198_v15 = vrot.slane %v197_v13, 1  ;;  %v192_v16 = vadd.f32 %v191_v14, %v190_v12 }
  0x48   : > { %v199_v17 = vadd.f32 %v198_v15, %v197_v13 }
  0xba   : > { %v203_v18 = vpop.permute.xlu0 %202 }
  0xbb   : > { %v205_v19 = vmul.f32 %v203_v18, %v192_v16  ;;  %v206_v20 = vmul.f32 %v203_v18, %v199_v17 }
  0xbd   : > { %v207_v21 = vsel %vm185_vm0, %v205_v19, -inf  ;;  %v214_v22 = vsel %vm185_vm0, %v206_v20, -inf }
  0xbe   : > { %v208_v23 = vrot.slane %v207_v21, 4  ;;  %v215_v24 = vrot.slane %v214_v22, 4 }
  0xc0   : > { %v209_v25 = vmax.f32 %v207_v21, %v208_v23  ;;  %v216_v26 = vmax.f32 %v214_v22, %v215_v24 }
  0xc2   : > { %v210_v27 = vrot.slane %v209_v25, 2  ;;  %v217_v28 = vrot.slane %v216_v26, 2 }
  0xc4   : > { %v211_v29 = vmax.f32 %v209_v25, %v210_v27  ;;  %v218_v30 = vmax.f32 %v216_v26, %v217_v28 }
  0xc6   : > { %v212_v31 = vrot.slane %v211_v29, 1  ;;  %v219_v32 = vrot.slane %v218_v30, 1 }
  0xc8   : > { %v213_v33 = vmax.f32 %v211_v29, %v212_v31  ;;  %v220_v34 = vmax.f32 %v218_v30, %v219_v32 }
  0xca   : > { %v221_v35 = vsub.f32 %v205_v19, %v213_v33  ;;  %v222_v36 = vsub.f32 %v206_v20, %v220_v34 }
  0xcc   : > { %v223_v37 = vmul.f32 1.442695, %v221_v35  ;;  %v225_v38 = vmul.f32 1.442695, %v222_v36 }
  0xce   : > { %433 = vpow2.f32 %v223_v37 }
  0xcf   : > { %435 = vpow2.f32 %v225_v38 }
  0xd8   : > { %v434_v39 = vpop.eup %433 }
  0xd9   : > { %v436_v40 = vpop.eup %435  ;;  %v227_v41 = vsel %vm185_vm0, %v434_v39, 0.0 }
  0xda   : > { %v228_v42 = vrot.slane %v227_v41, 4  ;;  %v234_v43 = vsel %vm185_vm0, %v436_v40, 0.0 }
  0xdb   : > { %v235_v44 = vrot.slane %v234_v43, 4 }
  0xdc   : > { %v229_v45 = vadd.f32 %v228_v42, %v227_v41 }
  0xdd   : > { %v236_v46 = vadd.f32 %v235_v44, %v234_v43 }
  0xde   : > { %v230_v47 = vrot.slane %v229_v45, 2 }
  0xdf   : > { %v237_v48 = vrot.slane %v236_v46, 2 }
  0xe0   : > { %v231_v49 = vadd.f32 %v230_v47, %v229_v45 }
  0xe1   : > { %v238_v50 = vadd.f32 %v237_v48, %v236_v46 }
  0xe2   : > { %v232_v51 = vrot.slane %v231_v49, 1 }
  0xe3   : > { %v239_v52 = vrot.slane %v238_v50, 1 }
  0xe4   : > { %v233_v53 = vadd.f32 %v232_v51, %v231_v49 }
  0xe5   : > { %v240_v54 = vadd.f32 %v239_v52, %v238_v50 }
  0xe6   : > { %437 = vrcp.f32 %v233_v53 }
  0xe7   : > { %439 = vrcp.f32 %v240_v54 }
  0xf0   : > { %v438_v55 = vpop.eup %437 }
  0xf1   : > { %v440_v56 = vpop.eup %439  ;;  %v243_v57 = vmul.f32 %v438_v55, %v434_v39 }
  0xf2   : > { %v244_v58 = vmul.f32 %v440_v56, %v436_v40 }
  0xf4   : > { %v247_v59 = vcombine.low %v243_v57, %v244_v58 }
  0xf6   : > { %249 = vst [vmem:[%s177_s6] sm:$0xff] %v247_v59 }
  0xf7   : > { %484 = shalt.err (!%p481_p6)
}
  0xf8   : > { %s485_s26 = scalar_lea.hbm %s709_s16, 128  ;;  %s489_s29 = scalar_lea.hbm %s760_s2, 256 }
  0xf9   : > { %p486_p4 = scmp.ne.s32.totalorder %s709_s16, %s485_s26  ;;  %p490_p1 = scmp.lt.u32.totalorder %s709_s16, %s760_s2 }
  0xfa   : > { %p491_p2 = scmp.lt.u32.totalorder %s489_s29, %s485_s26  ;;  %p493_p8 = scmp.lt.u32.totalorder %s485_s26, %s709_s16 }
  0xfb   : > { %p487_p10 = pnand %p486_p4, %p769_p9 }
  0xfc   : > { %p492_p5 = por %p491_p2, %p490_p1 }
  0xfd   : > { %p488_p12 = pneg %p487_p10 }
  0xfe   : > { %p494_p11 = por %p493_p8, %p492_p5 }
 0x100   : > { %p495_p0 = pnand %p494_p11, %p488_p12 }
 0x102   : > { %498 = shalt.err (!%p495_p0)
}
 0x103   : > { %370 = dma.vmem_to_hbm [thread:$0]  (%p769_p9), %s711_s7, 128, %s709_s16, %s251_s18  }
 0x104 PF: > { %s279_s30 = sand.u32 1, %s533_s9   ;;  %p770_p7 = scmp.ne.s32.totalorder %s765_s24, 0 }
 0x105   : > { %p771_p13 = scmp.ge.s32.totalorder %s553_s14, 2  ;;  %s280_s4 = scalar_lea.sflag [#allocation4], %s279_s30 }
 0x107   : > { %p377_p3 = pnand %p771_p13, %p770_p7 }
 0x109   : > { %528 = dma.done.wait (!%p377_p3), %s280_s4, 128  }
 0x10a   : > { %530 = vsyncadd (!%p377_p3), %s280_s4, 4294967168  ;;  %s18_s14 = sadd.s32 1, %s553_s14   ;;  %s772_s9 = smov %s537_s10 }
 0x10b   : > { %p15_p6 = scmp.ge.s32.totalorder %s18_s14, 4   ;;  %s773_s10 = smov %s541_s11 }
 0x10c   : > { %s774_s11 = smov %s629_s23  ;;  %s775_s12 = smov %s549_s13 }
 0x10d   : > { %s776_s13 = smov %s778_s17  ;;  %17 = sbr.rel (!%p15_p6) target bundleno = 6 (0x6), region = 73 }
 0x114   :  { %285 = vsyncpa [#allocation3], 1 }
 0x115   :  { %287 = vsyncpa [#allocation3 + $0x1], 1 }
 0x116   :  { %288 = vsyncpa [#allocation4], 1 }
 0x117   :  { %290 = vsyncpa [#allocation4 + $0x1], 1 }

</bundles_post_ra>
